<compile_context>
chip_gen: v7x
topology: tpu7x:2x2x1
jax: 0.10.0
libtpu: 0.0.40
codegen_flags: <defaults>
</compile_context>

<pallas_src>
import functools

import jax
import jax.numpy as jnp
from jax.experimental import pallas as pl
from jax.experimental.pallas import tpu as pltpu


def _tv_kernel(x_ref, sum_h_ref, sum_w_ref, *, k):
    """Accumulates per-lane sums of squared finite differences.

    x_ref:      (TB, H, W) block of channels (input dtype).
    sum_h_ref:  (1, 1, W) f32 running sum of squared H-diffs (resident output).
    sum_w_ref:  (1, 1, W) f32 running sum of squared W-diffs (resident output,
                wrapped lanes [W-k:] are dropped later in the wrapper).
    """
    i = pl.program_id(1)  # reduction ("arbitrary") axis

    @pl.when(i == 0)
    def _init():
        sum_h_ref[...] = jnp.zeros_like(sum_h_ref)
        sum_w_ref[...] = jnp.zeros_like(sum_w_ref)

    x = x_ref[...]                                   # (TB, H, W), input dtype
    _, h, w = x.shape

    # Height (sublane) finite difference: x[:, r+k, :] - x[:, r, :].
    # TODO(synk): if the sublane-offset slice lowers to a full-tile copy
    #             (check pl.lower_as_mlir), switch to pltpu.roll(x, h-k, 1)
    #             plus a loop-invariant (1, H, 1) 0/1 row mask.
    dh = (x[:, k:, :] - x[:, :-k, :]).astype(jnp.float32)      # (TB, H-k, W)

    # Width (lane) finite difference via XLU rotate (no lane-misaligned slice,
    # no per-step mask): roll(x, w-k)[..., c] == x[..., (c+k) % w].
    x_shift = pltpu.roll(x, shift=w - k, axis=2)
    dw = (x_shift - x).astype(jnp.float32)                     # (TB, H, W)

    # Lane-dense partial sums; the single cross-lane reduce (and the dropping
    # of the wrapped lanes of sum_w) happens once in the wrapper.
    # TODO(synk): if the bundle shows VALU as the saturated slot on v7x, do
    #             the (TB*H)-row reduce with a ones-vector MXU matmul instead.
    sum_h_ref[...] += jnp.sum(dh * dh, axis=(0, 1), keepdims=True)
    sum_w_ref[...] += jnp.sum(dw * dw, axis=(0, 1), keepdims=True)


def _chip_params():
    """Generation-aware (n_par, target block bytes, vmem_limit_bytes)."""
    try:
        kind = jax.devices()[0].device_kind.lower()
    except Exception:
        kind = ""
    if "v7" in kind or "7x" in kind:
        # v7x: 2 TensorCores/chip, 64 MiB VMEM per core -> small blocks,
        # split the reduction across both cores.
        # TODO(synk): verify in xprof that the leading "parallel" axis really
        #             lands on both TCs; if not, use pltpu.CORE_PARALLEL.
        return 2, 3584 * 1024, 56 * 1024 * 1024
    if "v6" in kind or "v5e" in kind or "v5 lite" in kind or "v5lite" in kind:
        # v5e / v6e: single TensorCore, 128 MiB VMEM -> big blocks, no split.
        return 1, 8 * 1024 * 1024, 96 * 1024 * 1024
    # Unknown / older chip: conservative defaults.
    return 1, 2 * 1024 * 1024, None


def _plan(bc, h, w, itemsize, target_bytes_override=None):
    """Pick (n_par, tb, steps_per_core, bc_main, rem, vmem_limit)."""
    n_par, target_bytes, vmem_limit = _chip_params()
    if target_bytes_override is not None:
        target_bytes = int(target_bytes_override)

    bytes_per_ch = max(1, h * w * itemsize)
    tb_target = int(max(1, min(bc, target_bytes // bytes_per_ch)))

    # Prefer a near-target divisor of bc: no padding, no remainder path.
    tb = 1
    for d in range(tb_target, 0, -1):
        if bc % d == 0:
            tb = d
            break
    if tb * 4 < tb_target:
        # No near-target divisor: keep the target block and let the wrapper
        # reduce the leftover channels with plain XLA ops (no jnp.pad copy).
        tb = tb_target

    steps_total = bc // tb
    if n_par == 2 and steps_total < 2:
        n_par = 1
    steps_per_core = steps_total // n_par
    bc_main = n_par * steps_per_core * tb
    rem = bc - bc_main
    return n_par, tb, steps_per_core, bc_main, rem, vmem_limit


class VariationLoss:
    """Pallas TPU implementation of the PyTorch VariationLoss module."""

    def __init__(self, k_size, target_block_bytes=None) -> None:
        self.k_size = int(k_size)
        self._target_block_bytes = target_block_bytes  # tuning / test hook

    def __call__(self, image: jax.Array) -> jax.Array:
        b, c, h, w = image.shape
        k = self.k_size
        if not (0 < k < h and k < w):
            # NOTE: the PyTorch reference silently returns NaN (mean of empty)
            # when k >= h or k >= w; we raise instead.
            raise ValueError(f"k_size={k} must satisfy 0 < k < min(h={h}, w={w})")

        bc = b * c
        n_par, tb, steps_per_core, bc_main, rem, vmem_limit = _plan(
            bc, h, w, image.dtype.itemsize, self._target_block_bytes)

        x = image.reshape(bc, h, w)
        kernel = functools.partial(_tv_kernel, k=k)

        cp_kwargs = dict(dimension_semantics=("parallel", "arbitrary"))
        if vmem_limit is not None:
            cp_kwargs["vmem_limit_bytes"] = vmem_limit

        sum_h_parts, sum_w_parts = pl.pallas_call(
            kernel,
            out_shape=(
                jax.ShapeDtypeStruct((n_par, 1, w), jnp.float32),
                jax.ShapeDtypeStruct((n_par, 1, w), jnp.float32),
            ),
            grid_spec=pltpu.PrefetchScalarGridSpec(
                num_scalar_prefetch=0,
                grid=(n_par, steps_per_core),
                in_specs=[
                    # Full x is passed; the index_map only covers the whole
                    # blocks [0, bc_main) -- leftover channels are untouched.
                    pl.BlockSpec(
                        (tb, h, w),
                        lambda p, i: (p * steps_per_core + i, 0, 0),
                    ),
                ],
                out_specs=[
                    pl.BlockSpec((1, 1, w), lambda p, i: (p, 0, 0)),
                    pl.BlockSpec((1, 1, w), lambda p, i: (p, 0, 0)),
                ],
            ),
            compiler_params=pltpu.CompilerParams(**cp_kwargs),
        )(x)

        # Single cross-lane reduce in the wrapper; the wrapped lanes of the
        # width diff are dropped here instead of being masked every grid step.
        sum_h = jnp.sum(sum_h_parts)
        sum_w = jnp.sum(sum_w_parts[..., : w - k])

        if rem:
            # Leftover channels (only when bc has no near-target divisor) are
            # reduced with plain XLA ops -- no jnp.pad HBM copy, no wasted
            # zero-channel streaming.
            xr = x[bc_main:]
            dh = (xr[:, k:, :] - xr[:, :-k, :]).astype(jnp.float32)
            dw = (xr[:, :, k:] - xr[:, :, :-k]).astype(jnp.float32)
            sum_h = sum_h + jnp.sum(dh * dh)
            sum_w = sum_w + jnp.sum(dw * dw)

        tv_h = sum_h / jnp.float32(bc * (h - k) * w)
        tv_w = sum_w / jnp.float32(bc * h * (w - k))
        return (tv_h + tv_w) / jnp.float32(3 * h * w)


def _reference(image, k):
    b, c, h, w = image.shape
    x = image.astype(jnp.float32)
    tv_h = jnp.mean((x[:, :, k:, :] - x[:, :, :-k, :]) ** 2)
    tv_w = jnp.mean((x[:, :, :, k:] - x[:, :, :, :-k]) ** 2)
    return (tv_h + tv_w) / (3 * h * w)


if __name__ == "__main__":
    key = jax.random.PRNGKey(0)

    # Primary test (shapes implied by the module).
    image = jax.random.normal(key, (2, 4, 16, 16), dtype=jnp.float32)
    out = jax.block_until_ready(VariationLoss(1)(image))
    ref = jax.block_until_ready(_reference(image, 1))
    assert jnp.allclose(out, ref, rtol=1e-5, atol=1e-6), (out, ref)

    # Odd channel count + k=2 (exercises the wrapped-lane drop in the wrapper).
    image2 = jax.random.normal(jax.random.PRNGKey(0), (1, 3, 16, 24),
                               dtype=jnp.float32)
    out2 = jax.block_until_ready(VariationLoss(2)(image2))
    ref2 = jax.block_until_ready(_reference(image2, 2))
    assert jnp.allclose(out2, ref2, rtol=1e-5, atol=1e-6), (out2, ref2)

    # Remainder path: bc=13 with a forced small block (no near-target divisor),
    # so the kernel covers 8 channels and the wrapper reduces the other 5.
    image3 = jax.random.normal(jax.random.PRNGKey(0), (1, 13, 8, 128),
                               dtype=jnp.float32)
    out3 = jax.block_until_ready(
        VariationLoss(1, target_block_bytes=32 * 1024)(image3))
    ref3 = jax.block_until_ready(_reference(image3, 1))
    assert jnp.allclose(out3, ref3, rtol=1e-5, atol=1e-6), (out3, ref3)

    # bf16 input (kernel diffs in bf16, squares/accumulates in f32).
    image4 = jax.random.normal(jax.random.PRNGKey(0), (2, 4, 16, 16),
                               dtype=jnp.bfloat16)
    out4 = jax.block_until_ready(VariationLoss(1)(image4))
    ref4 = jax.block_until_ready(_reference(image4, 1))
    assert jnp.allclose(out4, ref4, rtol=5e-2, atol=1e-5), (out4, ref4)

    print("KERNEL_OK")
</pallas_src>

<mosaic_0001>
module attributes {stable_mosaic.version = 11 : i64} {
  func.func @_tv_kernel(%arg0: i32, %arg1: i32, %arg2: memref<8x16x16xf32, #tpu.memory_space<vmem>>, %arg3: memref<1x1x16xf32, #tpu.memory_space<vmem>>, %arg4: memref<1x1x16xf32, #tpu.memory_space<vmem>>) attributes {dimension_semantics = [#tpu.dimension_semantics<parallel>, #tpu.dimension_semantics<arbitrary>], iteration_bounds = array<i64: 1, 1>, scalar_prefetch = 0 : i64, scratch_operands = 0 : i64, tpu.core_type = #tpu.core_type<tc>, window_params = [{transform_indices = @transform_0, window_bounds = array<i64: 8, 16, 16>}, {transform_indices = @transform_1, window_bounds = array<i64: 1, 1, 16>}, {transform_indices = @transform_2, window_bounds = array<i64: 1, 1, 16>}]} {
    %c0_i32 = arith.constant 0 : i32
    %0 = arith.cmpi eq, %arg1, %c0_i32 : i32
    %1 = arith.extui %0 : i1 to i32
    %c0_i32_0 = arith.constant 0 : i32
    %2 = arith.cmpi ne, %1, %c0_i32_0 : i32
    scf.if %2 {
      %cst_16 = arith.constant 0.000000e+00 : f32
      %21 = vector.broadcast %cst_16 : f32 to vector<1x1x16xf32>
      %c0_17 = arith.constant 0 : index
      %c0_18 = arith.constant 0 : index
      %c0_19 = arith.constant 0 : index
      %22 = vector.load %arg3[%c0_17, %c0_18, %c0_19] : memref<1x1x16xf32, #tpu.memory_space<vmem>>, vector<1x1x16xf32>
      tpu.vector_store %arg3[%c0_17, %c0_18, %c0_19], %21 {strides = array<i32>} : memref<1x1x16xf32, #tpu.memory_space<vmem>>, vector<1x1x16xf32>,
      %cst_20 = arith.constant 0.000000e+00 : f32
      %23 = vector.broadcast %cst_20 : f32 to vector<1x1x16xf32>
      %c0_21 = arith.constant 0 : index
      %c0_22 = arith.constant 0 : index
      %c0_23 = arith.constant 0 : index
      %24 = vector.load %arg4[%c0_21, %c0_22, %c0_23] : memref<1x1x16xf32, #tpu.memory_space<vmem>>, vector<1x1x16xf32>
      tpu.vector_store %arg4[%c0_21, %c0_22, %c0_23], %23 {strides = array<i32>} : memref<1x1x16xf32, #tpu.memory_space<vmem>>, vector<1x1x16xf32>,
    } else {
    }
    %c0 = arith.constant 0 : index
    %c0_1 = arith.constant 0 : index
    %c0_2 = arith.constant 0 : index
    %3 = vector.load %arg2[%c0, %c0_1, %c0_2] : memref<8x16x16xf32, #tpu.memory_space<vmem>>, vector<8x16x16xf32>
    %4 = vector.extract_strided_slice %3 {offsets = [0, 1, 0], sizes = [8, 15, 16], strides = [1, 1, 1]} : vector<8x16x16xf32> to vector<8x15x16xf32>
    %5 = vector.extract_strided_slice %3 {offsets = [0, 0, 0], sizes = [8, 15, 16], strides = [1, 1, 1]} : vector<8x16x16xf32> to vector<8x15x16xf32>
    %6 = arith.subf %4, %5 : vector<8x15x16xf32>
    %c15_i32 = arith.constant 15 : i32
    %7 = tpu.dynamic_rotate %3 by %c15_i32 dim 2 : vector<8x16x16xf32>, i32 -> vector<8x16x16xf32>
    %8 = arith.subf %7, %3 : vector<8x16x16xf32>
    %c0_3 = arith.constant 0 : index
    %c0_4 = arith.constant 0 : index
    %c0_5 = arith.constant 0 : index
    %9 = vector.load %arg3[%c0_3, %c0_4, %c0_5] : memref<1x1x16xf32, #tpu.memory_space<vmem>>, vector<1x1x16xf32>
    %10 = arith.mulf %6, %6 : vector<8x15x16xf32>
    %cst = arith.constant dense<0.000000e+00> : vector<16xf32>
    %11 = vector.multi_reduction <add>, %10, %cst [0, 1] : vector<8x15x16xf32> to vector<16xf32>
    %12 = vector.shape_cast %11 : vector<16xf32> to vector<1x1x16xf32>
    %13 = arith.addf %9, %12 : vector<1x1x16xf32>
    %c0_6 = arith.constant 0 : index
    %c0_7 = arith.constant 0 : index
    %c0_8 = arith.constant 0 : index
    %14 = vector.load %arg3[%c0_6, %c0_7, %c0_8] : memref<1x1x16xf32, #tpu.memory_space<vmem>>, vector<1x1x16xf32>
    tpu.vector_store %arg3[%c0_6, %c0_7, %c0_8], %13 {strides = array<i32>} : memref<1x1x16xf32, #tpu.memory_space<vmem>>, vector<1x1x16xf32>,
    %c0_9 = arith.constant 0 : index
    %c0_10 = arith.constant 0 : index
    %c0_11 = arith.constant 0 : index
    %15 = vector.load %arg4[%c0_9, %c0_10, %c0_11] : memref<1x1x16xf32, #tpu.memory_space<vmem>>, vector<1x1x16xf32>
    %16 = arith.mulf %8, %8 : vector<8x16x16xf32>
    %cst_12 = arith.constant dense<0.000000e+00> : vector<16xf32>
    %17 = vector.multi_reduction <add>, %16, %cst_12 [0, 1] : vector<8x16x16xf32> to vector<16xf32>
    %18 = vector.shape_cast %17 : vector<16xf32> to vector<1x1x16xf32>
    %19 = arith.addf %15, %18 : vector<1x1x16xf32>
    %c0_13 = arith.constant 0 : index
    %c0_14 = arith.constant 0 : index
    %c0_15 = arith.constant 0 : index
    %20 = vector.load %arg4[%c0_13, %c0_14, %c0_15] : memref<1x1x16xf32, #tpu.memory_space<vmem>>, vector<1x1x16xf32>
    tpu.vector_store %arg4[%c0_13, %c0_14, %c0_15], %19 {strides = array<i32>} : memref<1x1x16xf32, #tpu.memory_space<vmem>>, vector<1x1x16xf32>,
    return
  }
  func.func @transform_0(%arg0: i32, %arg1: i32) -> (i32, i32, i32) {
    %c1_i32 = arith.constant 1 : i32
    %0 = arith.muli %arg0, %c1_i32 : i32
    %1 = arith.addi %0, %arg1 : i32
    %c0_i32 = arith.constant 0 : i32
    %c0_i32_0 = arith.constant 0 : i32
    %c0_i32_1 = arith.constant 0 : i32
    return %1, %c0_i32, %c0_i32_0 : i32, i32, i32
  }
  func.func @transform_1(%arg0: i32, %arg1: i32) -> (i32, i32, i32) {
    %c0_i32 = arith.constant 0 : i32
    %c0_i32_0 = arith.constant 0 : i32
    %c0_i32_1 = arith.constant 0 : i32
    return %arg0, %c0_i32, %c0_i32_0 : i32, i32, i32
  }
  func.func @transform_2(%arg0: i32, %arg1: i32) -> (i32, i32, i32) {
    %c0_i32 = arith.constant 0 : i32
    %c0_i32_0 = arith.constant 0 : i32
    %c0_i32_1 = arith.constant 0 : i32
    return %arg0, %c0_i32, %c0_i32_0 : i32, i32, i32
  }
}

</mosaic_0001>

<bundles_post_ra>
// kernel: tpu_custom_call.1
= control target key start
LH: loop header
LB: loop body
LE: loop exit
PB: predicated region body
PF: predicated region fallthrough
CT: control target
= control target key end

     0   :  { %8 = vsyncpa [#allocation3], 0  ;;  %s946_s0 = inlined_call_operand.hbm [shape: f32[8,16,16], index: 0, kind: input, shape index: {}]   ;;  %s947_s1 = inlined_call_operand.hbm [shape: f32[1,1,16], index: 1, kind: output, shape index: {0}]   ;;  %s948_s2 = inlined_call_operand.hbm [shape: f32[1,1,16], index: 2, kind: output, shape index: {1}]  }
   0x1   :  { %9 = vsyncpa [#allocation4], 0 }
   0x2   :  { %10 = vsyncpa [#allocation7], 0  ;;  %s592_s9 = smov [#allocation2]   ;;  %s520_s13 = scalar_lea.hbm %s946_s0, 2048 }
   0x3   :  { %s21_s10 = sshll.u32 %s592_s9, 4  ;;  %p521_p0 = scmp.ne.s32.totalorder %s946_s0, %s520_s13  ;;  %s22_s10 = int_to_ptr.vmem [resolvable:$true] %s21_s10 }
   0x4   :  { %p524_p1 = scmp.lt.u32.totalorder %s520_s13, %s946_s0 }
   0x6   :  { %p526_p2 = pnand %p524_p1, %p521_p0 }
   0x8   :  { %529 = shalt.err (!%p526_p2)
}
   0x9   :  { %s530_s18 = scalar_lea.vmem %s22_s10, 2048  ;;  %p535_p4 = scmp.lt.s32.totalorder %s22_s10, %s22_s10 }
   0xa   :  { %p531_p3 = scmp.ne.s32.totalorder %s22_s10, %s530_s18  ;;  %p536_p5 = scmp.lt.s32.totalorder %s530_s18, %s530_s18 }
   0xc   :  { %p537_p6 = por %p536_p5, %p535_p4 }
   0xe   :  { %p538_p7 = pnand %p537_p6, %p531_p3 }
  0x10   :  { %541 = shalt.err (!%p538_p7)
}
  0x11   :  { %s593_s19 = smov 128   ;;  %s594_s20 = smov 8  }
  0x12   :  { %27 = dma.hbm_to_vmem [thread:$0]  %s946_s0, 2048, %s22_s10, [#allocation3], %s593_s19, %s593_s19, %s594_s20  }
  0x13   :  { %586 = dma.done.wait [#allocation3], 2048  }
  0x14   :  { %587 = vsyncadd [#allocation3], 4294965248  ;;  %v629_v0 = vld [vmem:[#allocation2] sm:$0xff]  ;;  %v631_v1 = vld [vmem:[#allocation2 + $0x10] sm:$0xff]  ;;  %s595_s23 = smov 16   ;;  %s596_s0 = smov 1  }
  0x15   :  { %130 = vrot.lane.b32.xlu0 %v629_v0, %s595_s23  ;;  %136 = vrot.lane.b32.xlu1 %v631_v1, %s595_s23  ;;  %v637_v2 = vld [vmem:[#allocation2 + $0x8] sm:$0xff]  ;;  %v639_v3 = vld [vmem:[#allocation2 + $0x18] sm:$0xff]  ;;  %v645_v4 = vld [vmem:[#allocation2 + $0x20] sm:$0xff]  ;;  %vm129_vm0 = vcmask 1047680   ;;  %vm37_vm1 = vcmask 122880   ;;  %v597_v48 = vmov 0.0  }
  0x16   :  { %v647_v5 = vld [vmem:[#allocation2 + $0x28] sm:$0xff]  ;;  %v653_v6 = vld [vmem:[#allocation2 + $0x30] sm:$0xff]  ;;  %v655_v7 = vld [vmem:[#allocation2 + $0x38] sm:$0xff]  ;;  %39 = vst.msk [vmem:[#allocation6] sm:$0x1] %vm37_vm1, %v597_v48  ;;  %v73_v51 = vrot.slane %v629_v0, 7 }
  0x17   :  { %v661_v8 = vld [vmem:[#allocation2 + $0x40] sm:$0xff]  ;;  %v663_v9 = vld [vmem:[#allocation2 + $0x48] sm:$0xff]  ;;  %v669_v10 = vld [vmem:[#allocation2 + $0x50] sm:$0xff]  ;;  %38 = vst.msk [vmem:[#allocation5] sm:$0x1] %vm37_vm1, %v597_v48  ;;  %v74_v52 = vrot.slane %v637_v2, 7 }
  0x18   :  { %v671_v11 = vld [vmem:[#allocation2 + $0x58] sm:$0xff]  ;;  %v677_v12 = vld [vmem:[#allocation2 + $0x60] sm:$0xff]  ;;  %v679_v13 = vld [vmem:[#allocation2 + $0x68] sm:$0xff]  ;;  %vm72_vm2 = vcmask 1040384   ;;  %v76_v54 = vrot.slane %v631_v1, 7  ;;  %v77_v56 = vrot.slane %v639_v3, 7  ;;  %v113_v58 = vsub.f32 %v629_v0, %v73_v51 }
  0x19   :  { %133 = vrot.lane.b32.xlu0 %v637_v2, %s595_s23  ;;  %139 = vrot.lane.b32.xlu1 %v639_v3, %s595_s23  ;;  %v685_v14 = vld [vmem:[#allocation2 + $0x70] sm:$0xff]  ;;  %v687_v15 = vld [vmem:[#allocation2 + $0x78] sm:$0xff]  ;;  %v75_v55 = vsel %vm72_vm2, %v73_v51, %v74_v52  ;;  %vm323_vm3 = vcmask 1046528   ;;  %vm364_vm4 = vcmask 130048   ;;  %vm366_vm5 = vcmask 129024   ;;  %s599_s24 = smov [#allocation5]  }
  0x1a   :  { %v114_v59 = vsub.f32 %v637_v2, %v75_v55  ;;  %v78_v60 = vsel %vm72_vm2, %v76_v54, %v77_v56  ;;  %v291_v61 = vmul.f32 %v113_v58, %v113_v58  ;;  %v115_v62 = vsub.f32 %v631_v1, %v76_v54  ;;  %s487_s25 = sshll.u32 %s599_s24, 4  ;;  %s488_s25 = int_to_ptr.vmem [resolvable:$true] %s487_s25 }
  0x1b   :  { %v85_v51 = vrot.slane %v661_v8, 7  ;;  %v86_v52 = vrot.slane %v663_v9, 7  ;;  %vm423_vm6 = vcmask 138248   ;;  %s542_s26 = scalar_lea.vmem %s488_s25, 16  ;;  %s546_s27 = scalar_lea.vmem %s488_s25, 32 }
  0x1c   :  { %v292_v63 = vmul.f32 %v114_v59, %v114_v59  ;;  %p543_p8 = scmp.ne.s32.totalorder %s488_s25, %s542_s26  ;;  %p547_p9 = scmp.lt.s32.totalorder %s488_s25, %s488_s25 }
  0x1d   :  { %142 = vrot.lane.b32.xlu0 %v645_v4, %s595_s23  ;;  %145 = vrot.lane.b32.xlu1 %v647_v5, %s595_s23  ;;  %p548_p10 = scmp.lt.s32.totalorder %s546_s27, %s542_s26 }
  0x1f   :  { %p549_p11 = por %p548_p10, %p547_p9 }
  0x21   :  { %148 = vrot.lane.b32.xlu0 %v653_v6, %s595_s23  ;;  %151 = vrot.lane.b32.xlu1 %v655_v7, %s595_s23  ;;  %p550_p12 = pnand %p549_p11, %p543_p8 }
  0x25   :  { %154 = vrot.lane.b32.xlu0 %v661_v8, %s595_s23  ;;  %157 = vrot.lane.b32.xlu1 %v663_v9, %s595_s23 }
  0x29   :  { %160 = vrot.lane.b32.xlu0 %v669_v10, %s595_s23  ;;  %163 = vrot.lane.b32.xlu1 %v671_v11, %s595_s23 }
  0x2d   :  { %166 = vrot.lane.b32.xlu0 %v677_v12, %s595_s23  ;;  %169 = vrot.lane.b32.xlu1 %v679_v13, %s595_s23 }
  0x31   :  { %172 = vrot.lane.b32.xlu0 %v685_v14, %s595_s23  ;;  %175 = vrot.lane.b32.xlu1 %v687_v15, %s595_s23 }
  0x35   :  { %228 = vrot.lane.b32.xlu1 %v637_v2, %s596_s0  ;;  %226 = vrot.lane.b32.xlu0 %v629_v0, %s596_s0 }
  0x39   :  { %230 = vrot.lane.b32.xlu1 %v631_v1, %s596_s0 }
  0x3d   :  { %232 = vrot.lane.b32.xlu1 %v639_v3, %s596_s0 }
  0x41   :  { %234 = vrot.lane.b32.xlu1 %v645_v4, %s596_s0 }
  0x45   :  { %236 = vrot.lane.b32.xlu1 %v647_v5, %s596_s0 }
  0x49   :  { %238 = vrot.lane.b32.xlu1 %v653_v6, %s596_s0 }
  0x4d   :  { %240 = vrot.lane.b32.xlu1 %v655_v7, %s596_s0 }
  0x87   :  { %v131_v16 = vpop.permute.xlu0 %130  ;;  %v137_v17 = vpop.permute.xlu1 %136 }
  0x88   :  { %v132_v18 = vsel %vm129_vm0, %v131_v16, %v629_v0  ;;  %v138_v19 = vsel %vm129_vm0, %v137_v17, %v631_v1  ;;  %v116_v16 = vsub.f32 %v639_v3, %v78_v60  ;;  %v79_v17 = vrot.slane %v645_v4, 7 }
  0x89   :  { %178 = vrot.lane.b32.xlu0 %v132_v18, %s595_s23  ;;  %v80_v18 = vrot.slane %v647_v5, 7 }
  0x8b   :  { %v134_v20 = vpop.permute.xlu0 %133  ;;  %v140_v21 = vpop.permute.xlu1 %139 }
  0x8c   :  { %v135_v22 = vsel %vm129_vm0, %v134_v20, %v637_v2  ;;  %v141_v23 = vsel %vm129_vm0, %v140_v21, %v639_v3  ;;  %v324_v20 = vrot.slane %v291_v61, 1  ;;  %v293_v21 = vmul.f32 %v115_v62, %v115_v62 }
  0x8d   :  { %182 = vrot.lane.b32.xlu0 %v138_v19, %s595_s23  ;;  %180 = vrot.lane.b32.xlu1 %v135_v22, %s595_s23  ;;  %v325_v22 = vrot.slane %v292_v63, 1  ;;  %v87_v62 = vsel %vm72_vm2, %v85_v51, %v86_v52 }
  0x8f   :  { %v143_v24 = vpop.permute.xlu0 %142  ;;  %v146_v26 = vpop.permute.xlu1 %145 }
  0x90   :  { %v144_v25 = vsel %vm129_vm0, %v143_v24, %v645_v4  ;;  %v147_v27 = vsel %vm129_vm0, %v146_v26, %v647_v5  ;;  %v117_v26 = vsub.f32 %v645_v4, %v79_v17 }
  0x91   :  { %184 = vrot.lane.b32.xlu0 %v141_v23, %s595_s23  ;;  %242 = vrot.lane.b32.xlu1 %v661_v8, %s596_s0  ;;  %v294_v23 = vmul.f32 %v116_v16, %v116_v16 }
  0x93   :  { %v149_v28 = vpop.permute.xlu0 %148  ;;  %v152_v30 = vpop.permute.xlu1 %151 }
  0x94   :  { %v150_v29 = vsel %vm129_vm0, %v149_v28, %v653_v6  ;;  %v153_v31 = vsel %vm129_vm0, %v152_v30, %v655_v7  ;;  %v327_v28 = vrot.slane %v293_v21, 1  ;;  %v328_v30 = vrot.slane %v294_v23, 1 }
  0x95   :  { %186 = vrot.lane.b32.xlu0 %v144_v25, %s595_s23  ;;  %244 = vrot.lane.b32.xlu1 %v663_v9, %s596_s0  ;;  %v81_v25 = vsel %vm72_vm2, %v79_v17, %v80_v18  ;;  %v122_v23 = vsub.f32 %v663_v9, %v87_v62 }
  0x96   :  { %v371_v56 = vsel %vm366_vm5, %v328_v30, 0.0 }
  0x97   :  { %v155_v32 = vpop.permute.xlu0 %154  ;;  %v158_v34 = vpop.permute.xlu1 %157 }
  0x98   :  { %v156_v33 = vsel %vm129_vm0, %v155_v32, %v661_v8  ;;  %v159_v35 = vsel %vm129_vm0, %v158_v34, %v663_v9  ;;  %v82_v32 = vrot.slane %v653_v6, 7 }
  0x99   :  { %188 = vrot.lane.b32.xlu0 %v147_v27, %s595_s23  ;;  %246 = vrot.lane.b32.xlu1 %v669_v10, %s596_s0 }
  0x9b   :  { %v161_v36 = vpop.permute.xlu0 %160  ;;  %v164_v38 = vpop.permute.xlu1 %163 }
  0x9c   :  { %v162_v37 = vsel %vm129_vm0, %v161_v36, %v669_v10  ;;  %v165_v39 = vsel %vm129_vm0, %v164_v38, %v671_v11  ;;  %v367_v36 = vsel %vm366_vm5, %v325_v22, 0.0  ;;  %v295_v38 = vmul.f32 %v117_v26, %v117_v26 }
  0x9d   :  { %190 = vrot.lane.b32.xlu0 %v150_v29, %s595_s23  ;;  %248 = vrot.lane.b32.xlu1 %v671_v11, %s596_s0  ;;  %v326_v29 = vsel %vm323_vm3, %v324_v20, %v325_v22  ;;  %v121_v22 = vsub.f32 %v661_v8, %v85_v51  ;;  %v89_v26 = vrot.slane %v671_v11, 7  ;;  %v91_v51 = vrot.slane %v677_v12, 7 }
  0x9f   :  { %v167_v40 = vpop.permute.xlu0 %166  ;;  %v170_v42 = vpop.permute.xlu1 %169 }
  0xa0   :  { %v168_v41 = vsel %vm129_vm0, %v167_v40, %v677_v12  ;;  %v171_v43 = vsel %vm129_vm0, %v170_v42, %v679_v13 }
  0xa1   :  { %192 = vrot.lane.b32.xlu0 %v153_v31, %s595_s23  ;;  %250 = vrot.lane.b32.xlu1 %v677_v12, %s596_s0  ;;  %v118_v31 = vsub.f32 %v647_v5, %v81_v25  ;;  %v88_v25 = vrot.slane %v669_v10, 7 }
  0xa3   :  { %v173_v44 = vpop.permute.xlu0 %172  ;;  %v176_v46 = vpop.permute.xlu1 %175 }
  0xa4   :  { %v174_v45 = vsel %vm129_vm0, %v173_v44, %v685_v14  ;;  %v177_v47 = vsel %vm129_vm0, %v176_v46, %v687_v15 }
  0xa5   :  { %194 = vrot.lane.b32.xlu0 %v156_v33, %s595_s23  ;;  %252 = vrot.lane.b32.xlu1 %v679_v13, %s596_s0  ;;  %v83_v33 = vrot.slane %v655_v7, 7 }
  0xa7   :  { %v775_v49 = vpop.permute.xlu1 %228  ;;  %v797_v24 = vpop.permute.xlu0 %226  ;;  %v84_v40 = vsel %vm72_vm2, %v82_v32, %v83_v33  ;;  %v299_v33 = vmul.f32 %v121_v22, %v121_v22 }
  0xa8   :  { %v120_v48 = vsub.f32 %v655_v7, %v84_v40 }
  0xa9   :  { %196 = vrot.lane.b32.xlu0 %v159_v35, %s595_s23  ;;  %254 = vrot.lane.b32.xlu1 %v685_v14, %s596_s0  ;;  %v365_v35 = vsel %vm364_vm4, %v326_v29, 0.0 }
  0xaa   :  { %v368_v42 = vadd.f32 %v367_v36, %v365_v35  ;;  %v298_v61 = vmul.f32 %v120_v48, %v120_v48  ;;  %v300_v35 = vmul.f32 %v122_v23, %v122_v23  ;;  %v90_v36 = vsel %vm72_vm2, %v88_v25, %v89_v26 }
  0xab   :  { %v777_v50 = vpop.permute.xlu1 %230 }
  0xac   :  { %v334_v21 = vrot.slane %v298_v61, 1 }
  0xad   :  { %198 = vrot.lane.b32.xlu0 %v162_v37, %s595_s23  ;;  %256 = vrot.lane.b32.xlu1 %v687_v15, %s596_s0  ;;  %v329_v37 = vsel %vm323_vm3, %v327_v28, %v328_v30 }
  0xae   :  { %v369_v44 = vsel %vm364_vm4, %v329_v37, 0.0 }
  0xaf   :  { %v781_v53 = vpop.permute.xlu1 %232  ;;  %v370_v54 = vadd.f32 %v369_v44, %v368_v42 }
  0xb1   :  { %200 = vrot.lane.b32.xlu0 %v165_v39, %s595_s23  ;;  %v296_v39 = vmul.f32 %v118_v31, %v118_v31  ;;  %v372_v63 = vadd.f32 %v371_v56, %v370_v54  ;;  %v379_v56 = vsel %vm366_vm5, %v334_v21, 0.0 }
  0xb3   :  { %v786_v57 = vpop.permute.xlu1 %234  ;;  %v331_v46 = vrot.slane %v296_v39, 1 }
  0xb5   :  { %202 = vrot.lane.b32.xlu0 %v168_v41, %s595_s23  ;;  %v375_v30 = vsel %vm366_vm5, %v331_v46, 0.0 }
  0xb7   :  { %v795_v19 = vpop.permute.xlu1 %236 }
  0xb9   :  { %204 = vrot.lane.b32.xlu0 %v171_v43, %s595_s23 }
  0xbb   :  { %v801_v27 = vpop.permute.xlu1 %238 }
  0xbd   :  { %206 = vrot.lane.b32.xlu0 %v174_v45, %s595_s23  ;;  %v330_v45 = vrot.slane %v295_v38, 1 }
  0xbf   :  { %v811_v41 = vpop.permute.xlu1 %240  ;;  %v332_v59 = vsel %vm323_vm3, %v330_v45, %v331_v46  ;;  %v123_v45 = vsub.f32 %v669_v10, %v88_v25  ;;  %v337_v46 = vrot.slane %v300_v35, 1  ;;  %v95_v25 = vrot.slane %v687_v15, 7 }
  0xc0   :  { %v373_v17 = vsel %vm364_vm4, %v332_v59, 0.0 }
  0xc1   :  { %208 = vrot.lane.b32.xlu0 %v177_v47, %s595_s23  ;;  %v119_v47 = vsub.f32 %v653_v6, %v82_v32  ;;  %v374_v28 = vadd.f32 %v373_v17, %v372_v63 }
  0xc3   :  { %v297_v60 = vmul.f32 %v119_v47, %v119_v47  ;;  %v376_v39 = vadd.f32 %v375_v30, %v374_v28  ;;  %v124_v47 = vsub.f32 %v671_v11, %v90_v36  ;;  %v125_v30 = vsub.f32 %v677_v12, %v91_v51 }
  0xc5   :  { %v333_v20 = vrot.slane %v297_v60, 1  ;;  %v302_v61 = vmul.f32 %v124_v47, %v124_v47 }
  0xc7   :  { %v335_v32 = vsel %vm323_vm3, %v333_v20, %v334_v21  ;;  %v94_v20 = vrot.slane %v685_v14, 7  ;;  %v340_v26 = vrot.slane %v302_v61, 1 }
  0xc8   :  { %v377_v44 = vsel %vm364_vm4, %v335_v32, 0.0 }
  0xc9   :  { %v378_v52 = vadd.f32 %v377_v44, %v376_v39  ;;  %v96_v39 = vsel %vm72_vm2, %v94_v20, %v95_v25 }
  0xfb   :  { %v179_v34 = vpop.permute.xlu0 %178 }
  0xfc   :  { %v210_v37 = vsel %vm129_vm0, %v179_v34, %v629_v0  ;;  %v92_v0 = vrot.slane %v679_v13, 7 }
  0xfd   :  { %v274_v48 = vsub.f32 %v210_v37, %v797_v24 }
  0xfe   :  { %v93_v17 = vsel %vm72_vm2, %v91_v51, %v92_v0 }
  0xff   :  { %v183_v43 = vpop.permute.xlu0 %182  ;;  %v181_v58 = vpop.permute.xlu1 %180  ;;  %v407_v62 = vmul.f32 %v274_v48, %v274_v48 }
 0x100   :  { %v211_v31 = vsel %vm129_vm0, %v181_v58, %v637_v2  ;;  %v336_v2 = vrot.slane %v299_v33, 1  ;;  %v212_v34 = vsel %vm129_vm0, %v183_v43, %v631_v1  ;;  %v301_v58 = vmul.f32 %v123_v45, %v123_v45 }
 0x101   :  { %v275_v40 = vsub.f32 %v211_v31, %v775_v49  ;;  %v276_v63 = vsub.f32 %v212_v34, %v777_v50  ;;  %v380_v43 = vadd.f32 %v379_v56, %v378_v52  ;;  %v424_v28 = vsel %vm423_vm6, %v407_v62, 0.0 }
 0x102   :  { %v338_v24 = vsel %vm323_vm3, %v336_v2, %v337_v46  ;;  %v339_v23 = vrot.slane %v301_v58, 1  ;;  %v126_v31 = vsub.f32 %v679_v13, %v93_v17  ;;  %v127_v52 = vsub.f32 %v685_v14, %v94_v20 }
 0x103   :  { %v185_v55 = vpop.permute.xlu0 %184  ;;  %v822_v18 = vpop.permute.xlu1 %242  ;;  %v408_v49 = vmul.f32 %v275_v40, %v275_v40  ;;  %v381_v22 = vsel %vm364_vm4, %v338_v24, 0.0 }
 0x104   :  { %v213_v59 = vsel %vm129_vm0, %v185_v55, %v639_v3  ;;  %v382_v35 = vadd.f32 %v381_v22, %v380_v43  ;;  %v341_v40 = vsel %vm323_vm3, %v339_v23, %v340_v26  ;;  %v304_v2 = vmul.f32 %v126_v31, %v126_v31 }
 0x105   :  { %v425_v21 = vsel %vm423_vm6, %v408_v49, 0.0  ;;  %v277_v3 = vsub.f32 %v213_v59, %v781_v53  ;;  %v385_v34 = vsel %vm364_vm4, %v341_v40, 0.0  ;;  %v128_v49 = vsub.f32 %v687_v15, %v96_v39 }
 0x106   :  { %v426_v53 = vadd.f32 %v425_v21, %v424_v28  ;;  %v343_v24 = vrot.slane %v304_v2, 1 }
 0x107   :  { %v187_v16 = vpop.permute.xlu0 %186  ;;  %v835_v38 = vpop.permute.xlu1 %244  ;;  %v410_v36 = vmul.f32 %v277_v3, %v277_v3  ;;  %v305_v3 = vmul.f32 %v127_v52, %v127_v52 }
 0x108   :  { %v214_v1 = vsel %vm129_vm0, %v187_v16, %v645_v4  ;;  %v409_v4 = vmul.f32 %v276_v63, %v276_v63 }
 0x109   :  { %v278_v16 = vsub.f32 %v214_v1, %v786_v57  ;;  %v345_v31 = vrot.slane %v305_v3, 1 }
 0x10a   :  { %v427_v44 = vsel %vm423_vm6, %v409_v4, 0.0 }
 0x10b   :  { %v189_v29 = vpop.permute.xlu0 %188  ;;  %v849_v60 = vpop.permute.xlu1 %246  ;;  %v411_v45 = vmul.f32 %v278_v16, %v278_v16  ;;  %v428_v47 = vadd.f32 %v427_v44, %v426_v53 }
 0x10c   :  { %v215_v50 = vsel %vm129_vm0, %v189_v29, %v647_v5  ;;  %v383_v29 = vsel %vm366_vm5, %v337_v46, 0.0  ;;  %v429_v46 = vsel %vm423_vm6, %v410_v36, 0.0  ;;  %v391_v36 = vsel %vm366_vm5, %v343_v24, 0.0 }
 0x10d   :  { %v279_v37 = vsub.f32 %v215_v50, %v795_v19  ;;  %v384_v48 = vadd.f32 %v383_v29, %v382_v35  ;;  %v431_v56 = vsel %vm423_vm6, %v411_v45, 0.0  ;;  %v430_v61 = vadd.f32 %v429_v46, %v428_v47 }
 0x10f   :  { %v191_v42 = vpop.permute.xlu0 %190  ;;  %v249_v33 = vpop.permute.xlu1 %248  ;;  %v412_v51 = vmul.f32 %v279_v37, %v279_v37  ;;  %v386_v62 = vadd.f32 %v385_v34, %v384_v48  ;;  %v432_v20 = vadd.f32 %v431_v56, %v430_v61 }
 0x110   :  { %v216_v32 = vsel %vm129_vm0, %v191_v42, %v653_v6  ;;  %v303_v42 = vmul.f32 %v125_v30, %v125_v30 }
 0x111   :  { %v280_v6 = vsub.f32 %v216_v32, %v801_v27  ;;  %v433_v63 = vsel %vm423_vm6, %v412_v51, 0.0 }
 0x112   :  { %v434_v25 = vadd.f32 %v433_v63, %v432_v20 }
 0x113   :  { %v193_v54 = vpop.permute.xlu0 %192 }
 0x114   :  { %v217_v57 = vsel %vm129_vm0, %v193_v54, %v655_v7  ;;  %v251_v54 = vpop.permute.xlu1 %250 }
 0x115   :  { %v281_v0 = vsub.f32 %v217_v57, %v811_v41  ;;  %v342_v41 = vrot.slane %v303_v42, 1 }
 0x117   :  { %v195_v55 = vpop.permute.xlu0 %194  ;;  %v414_v17 = vmul.f32 %v281_v0, %v281_v0  ;;  %v344_v23 = vsel %vm323_vm3, %v342_v41, %v343_v24 }
 0x118   :  { %v218_v19 = vsel %vm129_vm0, %v195_v55, %v661_v8  ;;  %v413_v8 = vmul.f32 %v280_v6, %v280_v6  ;;  %v253_v50 = vpop.permute.xlu1 %252 }
 0x119   :  { %v282_v58 = vsub.f32 %v218_v19, %v822_v18 }
 0x11a   :  { %v435_v55 = vsel %vm423_vm6, %v413_v8, 0.0 }
 0x11b   :  { %v197_v5 = vpop.permute.xlu0 %196  ;;  %v415_v22 = vmul.f32 %v282_v58, %v282_v58  ;;  %v436_v30 = vadd.f32 %v435_v55, %v434_v25  ;;  %v465_v25 = vlaneseq }
 0x11c   :  { %v219_v27 = vsel %vm129_vm0, %v197_v5, %v663_v9  ;;  %v387_v9 = vsel %vm366_vm5, %v340_v26, 0.0  ;;  %v389_v5 = vsel %vm364_vm4, %v344_v23, 0.0  ;;  %v255_v45 = vpop.permute.xlu1 %254 }
 0x11d   :  { %v283_v1 = vsub.f32 %v219_v27, %v835_v38  ;;  %v388_v28 = vadd.f32 %v387_v9, %v386_v62  ;;  %v437_v38 = vsel %vm423_vm6, %v414_v17, 0.0  ;;  %v439_v32 = vsel %vm423_vm6, %v415_v22, 0.0 }
 0x11e   :  { %v438_v37 = vadd.f32 %v437_v38, %v436_v30  ;;  %v598_v22 = vmov 1966171168  }
 0x11f   :  { %v199_v7 = vpop.permute.xlu0 %198  ;;  %v416_v4 = vmul.f32 %v283_v1, %v283_v1  ;;  %v390_v57 = vadd.f32 %v389_v5, %v388_v28  ;;  %v463_v23 = vunpack.c.l.s4 %v598_v22 }
 0x120   :  { %v220_v59 = vsel %vm129_vm0, %v199_v7, %v669_v10  ;;  %v306_v10 = vmul.f32 %v128_v49, %v128_v49  ;;  %v440_v40 = vadd.f32 %v439_v32, %v438_v37  ;;  %v257_v8 = vpop.permute.xlu1 %256 }
 0x121   :  { %v284_v21 = vsub.f32 %v220_v59, %v849_v60  ;;  %v441_v29 = vsel %vm423_vm6, %v416_v4, 0.0  ;;  %v392_v47 = vadd.f32 %v391_v36, %v390_v57 }
 0x122   :  { %v346_v53 = vrot.slane %v306_v10, 1  ;;  %v442_v19 = vadd.f32 %v441_v29, %v440_v40 }
 0x123   :  { %v201_v43 = vpop.permute.xlu0 %200  ;;  %v417_v60 = vmul.f32 %v284_v21, %v284_v21 }
 0x124   :  { %v221_v18 = vsel %vm129_vm0, %v201_v43, %v671_v11  ;;  %v347_v2 = vsel %vm323_vm3, %v345_v31, %v346_v53 }
 0x125   :  { %v285_v26 = vsub.f32 %v221_v18, %v249_v33  ;;  %v443_v44 = vsel %vm423_vm6, %v417_v60, 0.0  ;;  %v393_v48 = vsel %vm364_vm4, %v347_v2, 0.0 }
 0x126   :  { %v394_v7 = vadd.f32 %v393_v48, %v392_v47  ;;  %v444_v34 = vadd.f32 %v443_v44, %v442_v19 }
 0x127   :  { %v203_v16 = vpop.permute.xlu0 %202  ;;  %v418_v39 = vmul.f32 %v285_v26, %v285_v26  ;;  %v464_v26 = vunpack.c.0.s8 %v463_v23 }
 0x128   :  { %v222_v11 = vsel %vm129_vm0, %v203_v16, %v677_v12  ;;  %v466_v16 = vshrl.u32 %v465_v25, 7 }
 0x129   :  { %v286_v35 = vsub.f32 %v222_v11, %v251_v54  ;;  %v445_v46 = vsel %vm423_vm6, %v418_v39, 0.0 }
 0x12a   :  { %v446_v56 = vadd.f32 %v445_v46, %v444_v34 }
 0x12b   :  { %v205_v33 = vpop.permute.xlu0 %204  ;;  %v419_v6 = vmul.f32 %v286_v35, %v286_v35 }
 0x12c   :  { %v223_v12 = vsel %vm129_vm0, %v205_v33, %v679_v13  ;;  %v395_v13 = vsel %vm366_vm5, %v346_v53, 0.0 }
 0x12d   :  { %v287_v42 = vsub.f32 %v223_v12, %v253_v50  ;;  %v447_v49 = vsel %vm423_vm6, %v419_v6, 0.0  ;;  %v396_v54 = vadd.f32 %v395_v13, %v394_v7 }
 0x12e   :  { %v448_v61 = vadd.f32 %v447_v49, %v446_v56 }
 0x12f   :  { %v420_v51 = vmul.f32 %v287_v42, %v287_v42  ;;  %v207_v0 = vpop.permute.xlu0 %206  ;;  %v397_v24 = vrot.slane %v396_v54, 4 }
 0x130   :  { %v224_v52 = vsel %vm129_vm0, %v207_v0, %v685_v14 }
 0x131   :  { %v288_v27 = vsub.f32 %v224_v52, %v255_v45  ;;  %v449_v58 = vsel %vm423_vm6, %v420_v51, 0.0  ;;  %v398_v17 = vadd.f32 %v397_v24, %v396_v54 }
 0x132   :  { %v450_v1 = vadd.f32 %v449_v58, %v448_v61 }
 0x133   :  { %v421_v59 = vmul.f32 %v288_v27, %v288_v27  ;;  %v209_v41 = vpop.permute.xlu0 %208  ;;  %v399_v9 = vrot.slane %v398_v17, 2 }
 0x134   :  { %v225_v62 = vsel %vm129_vm0, %v209_v41, %v687_v15  ;;  %v290_v15 = vld [vmem:[#allocation5] sm:$0x1] }
 0x135   :  { %v451_v63 = vsel %vm423_vm6, %v421_v59, 0.0  ;;  %v289_v14 = vsub.f32 %v225_v62, %v257_v8  ;;  %v400_v18 = vadd.f32 %v399_v9, %v398_v17 }
 0x136   :  { %v452_v20 = vadd.f32 %v451_v63, %v450_v1 }
 0x137   :  { %v422_v43 = vmul.f32 %v289_v14, %v289_v14  ;;  %v401_v10 = vrot.slane %v400_v18, 1 }
 0x139   :  { %v453_v21 = vsel %vm423_vm6, %v422_v43, 0.0  ;;  %v402_v50 = vadd.f32 %v401_v10, %v400_v18 }
 0x13a   :  { %v454_v3 = vadd.f32 %v453_v21, %v452_v20 }
 0x13b   :  { %v403_v38 = vadd.f32 %v402_v50, %v290_v15 }
 0x13c   :  { %v455_v55 = vrot.slane %v454_v3, 4 }
 0x13d   :  { %405 = vst.msk [vmem:[#allocation5] sm:$0x1] %vm37_vm1, %v403_v38 }
 0x13e   :  { %v456_v28 = vadd.f32 %v455_v55, %v454_v3 }
 0x140   :  { %v457_v4 = vrot.slane %v456_v28, 2 }
 0x142   :  { %v458_v30 = vadd.f32 %v457_v4, %v456_v28 }
 0x143   :  { %553 = shalt.err (!%p550_p12)
}
 0x144   :  { %s554_s30 = scalar_lea.hbm %s947_s1, 16 }
 0x145   :  { %p555_p13 = scmp.ne.s32.totalorder %s947_s1, %s554_s30  ;;  %p558_p0 = scmp.lt.u32.totalorder %s554_s30, %s947_s1 }
 0x147   :  { %p560_p1 = pnand %p558_p0, %p555_p13 }
 0x149   :  { %563 = shalt.err (!%p560_p1)
}
 0x14a   :  { %490 = dma.vmem_to_hbm [thread:$0]  %s488_s25, 16, %s947_s1, [#allocation4]   ;;  %v459_v60 = vrot.slane %v458_v30, 1  ;;  %v467_v11 = vsub.s32 %v464_v26, %v466_v16  ;;  %v406_v35 = vld [vmem:[#allocation6] sm:$0x1] }
 0x14b   :  { %s600_s9 = smov 127   ;;  %s601_s10 = smov [#allocation6]  }
 0x14c   :  { %v460_v31 = vadd.f32 %v459_v60, %v458_v30  ;;  %s497_s11 = sshll.u32 %s601_s10, 4  ;;  %s498_s11 = int_to_ptr.vmem [resolvable:$true] %s497_s11 }
 0x14d   :  { %s564_s12 = scalar_lea.vmem %s498_s11, 16  ;;  %s568_s13 = scalar_lea.vmem %s498_s11, 32 }
 0x14e   :  { %v468_v53 = vrot.slane %v460_v31, %v467_v11  ;;  %p565_p2 = scmp.ne.s32.totalorder %s498_s11, %s564_s12  ;;  %p569_p3 = scmp.lt.s32.totalorder %s498_s11, %s498_s11 }
 0x14f   :  { %p570_p4 = scmp.lt.s32.totalorder %s568_s13, %s564_s12 }
 0x150   :  { %v475_v32 = vrot.slane %v468_v53, %v467_v11 }
 0x151   :  { %p571_p5 = por %p570_p4, %p569_p3 }
 0x152   :  { %476 = vrot.lane.b32.xlu0 %v475_v32, %s600_s9 }
 0x153   :  { %p572_p6 = pnand %p571_p5, %p565_p2 }
 0x1c4   :  { %v477_v36 = vpop.permute.xlu0 %476 }
 0x1c5   :  { %v479_v37 = vadd.f32 %v477_v36, %v406_v35 }
 0x1c7   :  { %480 = vst.msk [vmem:[#allocation6] sm:$0x1] %vm37_vm1, %v479_v37 }
 0x1c8   :  { %575 = shalt.err (!%p572_p6)
}
 0x1c9   :  { %s576_s15 = scalar_lea.hbm %s948_s2, 16 }
 0x1ca   :  { %p577_p7 = scmp.ne.s32.totalorder %s948_s2, %s576_s15  ;;  %p580_p8 = scmp.lt.u32.totalorder %s576_s15, %s948_s2 }
 0x1cc   :  { %p582_p9 = pnand %p580_p8, %p577_p7 }
 0x1ce   :  { %585 = shalt.err (!%p582_p9)
}
 0x1cf   :  { %500 = dma.vmem_to_hbm [thread:$0]  %s498_s11, 16, %s948_s2, [#allocation7]  }
 0x1d0   :  { %588 = dma.done.wait [#allocation4], 16  }
 0x1d1   :  { %589 = vsyncadd [#allocation4], 4294967280 }
 0x1d2   :  { %590 = dma.done.wait [#allocation7], 16  }
 0x1d3   :  { %591 = vsyncadd [#allocation7], 4294967280 }
 0x1d4   :  { %507 = vsyncpa [#allocation3], 1 }
 0x1d5   :  { %508 = vsyncpa [#allocation4], 1 }
 0x1d6   :  { %509 = vsyncpa [#allocation7], 1 }

</bundles_post_ra>
